<compile_context>
chip_gen: v7x
topology: tpu7x:2x2x1
jax: 0.10.0
libtpu: 0.0.40
codegen_flags: <defaults>
</compile_context>

<pallas_src>
import functools
import math

import jax
import jax.numpy as jnp
from jax.experimental import pallas as pl
from jax.experimental.pallas import tpu as pltpu


# ---------------------------------------------------------------------------
# Pallas kernels (jnp-only bodies -> lower on TPU and under the interpreter)
# ---------------------------------------------------------------------------

def _matmul_affine_kernel(x_ref, w_ref, scale_ref, shift_ref, o_ref, *, relu_in):
    """o = (relu?(x) @ w) * scale + shift   (ReLU -> Conv -> BN, fused)."""
    x = x_ref[...].astype(jnp.float32)
    if relu_in:
        x = jnp.maximum(x, 0.0)
    acc = jnp.dot(x, w_ref[...].astype(jnp.float32),
                  preferred_element_type=jnp.float32)
    o_ref[...] = (acc * scale_ref[...] + shift_ref[...]).astype(o_ref.dtype)


def _sep_unit_kernel(p_ref, wdw_ref, wpw_ref, scale_ref, shift_ref, o_ref, *,
                     taps, cin):
    """ReLU -> depthwise conv (tap MAC) -> 1x1 conv (MXU) -> BN, fused.

    p_ref:   (R, taps*cin) im2col patches, tap-major / channel-minor
    wdw_ref: (1, taps*cin) depthwise weights, same layout
    wpw_ref: (cin, cout)   pointwise weights
    """
    h = None
    for t in range(taps):
        lo = t * cin
        x = jnp.maximum(p_ref[:, lo:lo + cin].astype(jnp.float32), 0.0)
        c = x * wdw_ref[:, lo:lo + cin].astype(jnp.float32)
        h = c if h is None else h + c
    acc = jnp.dot(h, wpw_ref[...].astype(jnp.float32),
                  preferred_element_type=jnp.float32)
    o_ref[...] = (acc * scale_ref[...] + shift_ref[...]).astype(o_ref.dtype)


def _pool_kernel(p_ref, invc_ref, scale_ref, shift_ref, o_ref, *, taps, cin, kind):
    """3x3 max / avg pool over im2col taps, fused with the following BN."""
    r = p_ref[:, 0:cin].astype(jnp.float32)
    for t in range(1, taps):
        lo = t * cin
        x = p_ref[:, lo:lo + cin].astype(jnp.float32)
        r = jnp.maximum(r, x) if kind == "max" else r + x
    if kind == "avg":
        r = r * invc_ref[...]        # count_include_pad=False divisor
    o_ref[...] = (r * scale_ref[...] + shift_ref[...]).astype(o_ref.dtype)


def _wsum_kernel(s_ref, w_ref, o_ref, *, k):
    """MixedOp: weighted sum of the stacked primitive outputs."""
    acc = s_ref[0].astype(jnp.float32) * w_ref[0]
    for t in range(1, k):
        acc = acc + s_ref[t].astype(jnp.float32) * w_ref[t]
    o_ref[...] = acc.astype(o_ref.dtype)


def _gap_kernel(x_ref, o_ref, *, s):
    """Global average pool: x (S, N, C) -> mean over S -> (N, C)."""
    acc = x_ref[0].astype(jnp.float32)
    for t in range(1, s):
        acc = acc + x_ref[t].astype(jnp.float32)
    o_ref[...] = (acc * (1.0 / s)).astype(o_ref.dtype)


# ---------------------------------------------------------------------------
# pallas_call plumbing (whole-array VMEM blocks; shapes here are tiny)
# ---------------------------------------------------------------------------

def _full_spec(shape):
    return pl.BlockSpec(shape, lambda *_: (0,) * len(shape))


def _pcall(kernel, out_sds, *args):
    return pl.pallas_call(
        kernel,
        grid=(1,),
        in_specs=[_full_spec(a.shape) for a in args],
        out_specs=_full_spec(out_sds.shape),
        out_shape=out_sds,
        compiler_params=pltpu.CompilerParams(
            dimension_semantics=("arbitrary",)),
    )(*args)


@functools.partial(jax.jit, static_argnames=("relu_in",))
def matmul_affine(x, w, scale, shift, *, relu_in):
    r, n = x.shape[0], w.shape[1]
    kern = functools.partial(_matmul_affine_kernel, relu_in=relu_in)
    return _pcall(kern, jax.ShapeDtypeStruct((r, n), x.dtype),
                  x, w, scale.reshape(1, n), shift.reshape(1, n))


@jax.jit
def sep_unit_call(p2d, wdw, wpw, scale, shift):
    cin, cout = wpw.shape
    taps = p2d.shape[1] // cin
    r = p2d.shape[0]
    kern = functools.partial(_sep_unit_kernel, taps=taps, cin=cin)
    return _pcall(kern, jax.ShapeDtypeStruct((r, cout), p2d.dtype),
                  p2d, wdw.reshape(1, taps * cin), wpw,
                  scale.reshape(1, cout), shift.reshape(1, cout))


@functools.partial(jax.jit, static_argnames=("kind",))
def pool_call(p2d, invc, scale, shift, *, kind):
    c = scale.shape[-1]
    taps = p2d.shape[1] // c
    r = p2d.shape[0]
    kern = functools.partial(_pool_kernel, taps=taps, cin=c, kind=kind)
    return _pcall(kern, jax.ShapeDtypeStruct((r, c), p2d.dtype),
                  p2d, invc, scale.reshape(1, c), shift.reshape(1, c))


@jax.jit
def wsum_call(stack, w):
    k, r, c = stack.shape
    kern = functools.partial(_wsum_kernel, k=k)
    return _pcall(kern, jax.ShapeDtypeStruct((r, c), stack.dtype), stack, w)


@jax.jit
def gap_call(x_snc):
    s, n, c = x_snc.shape
    kern = functools.partial(_gap_kernel, s=s)
    return _pcall(kern, jax.ShapeDtypeStruct((n, c), x_snc.dtype), x_snc)


# ---------------------------------------------------------------------------
# Layout helpers (pure data movement, host-side)
# ---------------------------------------------------------------------------

def _im2col(x, k, stride, padding, dilation, pad_value=0.0):
    """x: (N, H, W, C) -> patches (N*Ho*Wo, k*k*C), tap-major / channel-minor."""
    n, h, w, c = x.shape
    xp = jnp.pad(x, ((0, 0), (padding, padding), (padding, padding), (0, 0)),
                 constant_values=pad_value)
    ho = (h + 2 * padding - dilation * (k - 1) - 1) // stride + 1
    wo = (w + 2 * padding - dilation * (k - 1) - 1) // stride + 1
    taps = []
    for i in range(k):
        for j in range(k):
            taps.append(
                xp[:,
                   i * dilation:i * dilation + (ho - 1) * stride + 1:stride,
                   j * dilation:j * dilation + (wo - 1) * stride + 1:stride,
                   :])
    p = jnp.stack(taps, axis=3)                     # (N, Ho, Wo, T, C)
    return p.reshape(n * ho * wo, k * k * c), (n, ho, wo)


# ---------------------------------------------------------------------------
# Network building blocks (each maps to one fused Pallas kernel call)
# ---------------------------------------------------------------------------

def conv_bn(x, w, scale, shift, *, k, stride, padding, dilation=1, relu_in):
    p, (n, ho, wo) = _im2col(x, k, stride, padding, dilation)
    y = matmul_affine(p, w, scale, shift, relu_in=relu_in)
    return y.reshape(n, ho, wo, -1)


def relu_conv_bn_1x1(x, w, scale, shift):
    n, h, wd, c = x.shape
    y = matmul_affine(x.reshape(n * h * wd, c), w, scale, shift, relu_in=True)
    return y.reshape(n, h, wd, -1)


def factorized_reduce(x, w1, w2, scale, shift):
    n, h, wd, c = x.shape
    a = x[:, ::2, ::2, :]
    b = x[:, 1::2, 1::2, :]
    ho, wo = a.shape[1], a.shape[2]
    half = w1.shape[1]
    y1 = matmul_affine(a.reshape(-1, c), w1, scale[:half], shift[:half], relu_in=True)
    y2 = matmul_affine(b.reshape(-1, c), w2, scale[half:], shift[half:], relu_in=True)
    return jnp.concatenate([y1, y2], axis=-1).reshape(n, ho, wo, 2 * half)


def sep_unit(x, wdw, wpw, scale, shift, *, k, stride, padding, dilation):
    p, (n, ho, wo) = _im2col(x, k, stride, padding, dilation)
    y = sep_unit_call(p, wdw, wpw, scale, shift)
    return y.reshape(n, ho, wo, -1)


def sep_conv(x, prm, *, k, stride):
    pad = (k - 1) // 2
    h = sep_unit(x, prm["dw1"], prm["pw1"], prm["s1"], prm["b1"],
                 k=k, stride=stride, padding=pad, dilation=1)
    return sep_unit(h, prm["dw2"], prm["pw2"], prm["s2"], prm["b2"],
                    k=k, stride=1, padding=pad, dilation=1)


def dil_conv(x, prm, *, k, stride):
    pad = 2 if k == 3 else 4
    return sep_unit(x, prm["dw"], prm["pw"], prm["s"], prm["b"],
                    k=k, stride=stride, padding=pad, dilation=2)


def pool_bn(x, kind, stride, scale, shift):
    n, h, wd, c = x.shape
    pad_value = 0.0 if kind == "avg" else -1e30
    p, (n2, ho, wo) = _im2col(x, 3, stride, 1, 1, pad_value=pad_value)
    if kind == "avg":
        ones = jnp.ones((n, h, wd, 1), x.dtype)
        cnt, _ = _im2col(ones, 3, stride, 1, 1, pad_value=0.0)     # (R, 9)
        invc = (1.0 / jnp.sum(cnt, axis=1, keepdims=True)).astype(x.dtype)
    else:
        invc = jnp.ones((p.shape[0], 1), x.dtype)
    y = pool_call(p, invc, scale, shift, kind=kind)
    return y.reshape(n2, ho, wo, c)


# PRIMITIVES order (as in the PyTorch spec):
#   0 none, 1 max_pool_3x3, 2 avg_pool_3x3, 3 skip_connect,
#   4 sep_conv_3x3, 5 sep_conv_5x5, 6 dil_conv_3x3, 7 dil_conv_5x5
def mixed_op(x, prm, w8):
    stride = prm["stride"]
    s_bn, b_bn = prm["pool_s"], prm["pool_b"]
    outs = [pool_bn(x, "max", stride, s_bn, b_bn),
            pool_bn(x, "avg", stride, s_bn, b_bn)]
    ws = [w8[1], w8[2]]
    if stride == 1:
        outs.append(x)                                   # skip_connect: Identity
    else:
        fr = prm["fr"]
        outs.append(factorized_reduce(x, fr["w1"], fr["w2"], fr["s"], fr["b"]))
    ws.append(w8[3])
    outs.append(sep_conv(x, prm["sep3"], k=3, stride=stride)); ws.append(w8[4])
    outs.append(sep_conv(x, prm["sep5"], k=5, stride=stride)); ws.append(w8[5])
    outs.append(dil_conv(x, prm["dil3"], k=3, stride=stride)); ws.append(w8[6])
    outs.append(dil_conv(x, prm["dil5"], k=5, stride=stride)); ws.append(w8[7])
    # 'none' (Zero) contributes w8[0] * 0 == 0 and is skipped exactly.
    stack = jnp.stack(outs, axis=0)                      # (7, N, Ho, Wo, C)
    k, n, ho, wo, c = stack.shape
    wv = jnp.stack(ws).reshape(k, 1, 1).astype(jnp.float32)
    y = wsum_call(stack.reshape(k, n * ho * wo, c), wv)
    return y.reshape(n, ho, wo, c)


def cell_forward(cp, s0, s1):
    p0 = cp["pre0"]
    if p0["kind"] == "fr":
        s0 = factorized_reduce(s0, p0["w1"], p0["w2"], p0["s"], p0["b"])
    else:
        s0 = relu_conv_bn_1x1(s0, p0["w"], p0["s"], p0["b"])
    p1 = cp["pre1"]
    s1 = relu_conv_bn_1x1(s1, p1["w"], p1["s"], p1["b"])

    states = [s0, s1]
    offset = 0
    weights = cp["weights"]
    for _ in range(cp["steps"]):
        acc = None
        for j, h in enumerate(states):
            o = mixed_op(h, cp["ops"][offset + j], weights[offset + j])
            acc = o if acc is None else acc + o
        offset += len(states)
        states.append(acc)
    return jnp.concatenate(states[-cp["multiplier"]:], axis=-1)


def network_forward(params, x_nchw):
    """NetworkCIFAR.forward -> (logits, logits_aux)."""
    x = jnp.transpose(x_nchw, (0, 2, 3, 1)).astype(jnp.float32)   # NHWC
    st = params["stem"]
    s = conv_bn(x, st["w"], st["s"], st["b"], k=3, stride=1, padding=1,
                relu_in=False)
    s0 = s1 = s
    for cp in params["cells"]:
        s0, s1 = s1, cell_forward(cp, s0, s1)
    # TODO(synk): AuxiliaryHeadCIFAR only runs when auxiliary=True and
    # training=True; this forward uses auxiliary=False -> logits_aux is None.
    n, h, w, c = s1.shape
    pooled = gap_call(s1.reshape(n, h * w, c).transpose(1, 0, 2))  # (N, C)
    fc = params["fc"]
    logits = matmul_affine(pooled, fc["w"], fc["s"], fc["b"], relu_in=False)
    return logits, None


# ---------------------------------------------------------------------------
# Parameter construction (fresh-init semantics)
# ---------------------------------------------------------------------------

class _KeyGen:
    def __init__(self, key):
        self._key = key

    def __call__(self):
        self._key, sub = jax.random.split(self._key)
        return sub


def _bn_consts(c, eps=1e-5):
    # TODO(synk): BatchNorm uses running statistics (inference semantics,
    # mean=0 / var=1 / gamma=1 / beta=0 at init); training-mode batch
    # statistics are not implemented.
    scale = jnp.full((c,), 1.0 / math.sqrt(1.0 + eps), jnp.float32)
    shift = jnp.zeros((c,), jnp.float32)
    return scale, shift


def _conv_w(kg, fan_in, fan_out):
    return jax.random.normal(kg(), (fan_in, fan_out), jnp.float32) / math.sqrt(fan_in)


def _dw_w(kg, taps, c):
    return jax.random.normal(kg(), (taps, c), jnp.float32) / math.sqrt(taps)


def _init_mixed_op(kg, c, stride):
    s_bn, b_bn = _bn_consts(c)
    p = {"stride": stride, "pool_s": s_bn, "pool_b": b_bn}
    if stride != 1:
        p["fr"] = dict(w1=_conv_w(kg, c, c // 2), w2=_conv_w(kg, c, c // 2),
                       s=s_bn, b=b_bn)
    for name, k in (("sep3", 3), ("sep5", 5)):
        p[name] = dict(dw1=_dw_w(kg, k * k, c), pw1=_conv_w(kg, c, c),
                       s1=s_bn, b1=b_bn,
                       dw2=_dw_w(kg, k * k, c), pw2=_conv_w(kg, c, c),
                       s2=s_bn, b2=b_bn)
    for name, k in (("dil3", 3), ("dil5", 5)):
        p[name] = dict(dw=_dw_w(kg, k * k, c), pw=_conv_w(kg, c, c),
                       s=s_bn, b=b_bn)
    return p


def _init_cell(kg, steps, multiplier, c_pp, c_p, c, reduction, reduction_prev):
    s_bn, b_bn = _bn_consts(c)
    cp = {"steps": steps, "multiplier": multiplier, "reduction": reduction}
    if reduction_prev:
        cp["pre0"] = dict(kind="fr", w1=_conv_w(kg, c_pp, c // 2),
                          w2=_conv_w(kg, c_pp, c // 2), s=s_bn, b=b_bn)
    else:
        cp["pre0"] = dict(kind="rcb", w=_conv_w(kg, c_pp, c), s=s_bn, b=b_bn)
    cp["pre1"] = dict(w=_conv_w(kg, c_p, c), s=s_bn, b=b_bn)
    ops = []
    for i in range(steps):
        for j in range(2 + i):
            stride = 2 if reduction and j < 2 else 1
            ops.append(_init_mixed_op(kg, c, stride))
    cp["ops"] = ops
    n_edges = sum(2 + i for i in range(steps))
    # TODO(synk): upstream NetworkCIFAR.forward passes self.drop_path_prob as
    # the Cell `weights` argument (a bug in the reference mash-up); we pass
    # proper per-edge softmax architecture weights, matching Cell.forward.
    alpha = jax.random.normal(kg(), (n_edges, 8), jnp.float32)
    cp["weights"] = jax.nn.softmax(alpha, axis=-1)
    return cp


def init_network(key, *, C=4, num_classes=10, layers=3, steps=4, multiplier=4):
    kg = _KeyGen(key)
    stem_multiplier = 3
    c_curr = stem_multiplier * C
    s_bn, b_bn = _bn_consts(c_curr)
    params = {"stem": dict(w=_conv_w(kg, 3 * 3 * 3, c_curr), s=s_bn, b=b_bn)}
    c_pp, c_p, c_curr = c_curr, c_curr, C
    cells = []
    reduction_prev = False
    for i in range(layers):
        if i in (layers // 3, 2 * layers // 3):
            c_curr *= 2
            reduction = True
        else:
            reduction = False
        cells.append(_init_cell(kg, steps, multiplier, c_pp, c_p, c_curr,
                                reduction, reduction_prev))
        reduction_prev = reduction
        c_pp, c_p = c_p, multiplier * c_curr
    params["cells"] = cells
    params["fc"] = dict(w=_conv_w(kg, c_p, num_classes),
                        s=jnp.ones((num_classes,), jnp.float32),
                        b=jnp.zeros((num_classes,), jnp.float32))
    return params


# ---------------------------------------------------------------------------
# Demo / smoke test
# ---------------------------------------------------------------------------

if __name__ == "__main__":
    root = jax.random.PRNGKey(0)
    pkey, xkey = jax.random.split(root)

    # Small config: C=4, 3 cells (normal + 2 reduction), steps=4, multiplier=4.
    params = init_network(pkey, C=4, num_classes=10, layers=3,
                          steps=4, multiplier=4)
    x = jax.random.normal(xkey, (2, 3, 16, 16), jnp.float32)

    logits, logits_aux = network_forward(params, x)
    logits = jax.block_until_ready(logits)

    assert logits.shape == (2, 10), logits.shape
    assert bool(jnp.all(jnp.isfinite(logits)))
    assert logits_aux is None

    # Cross-check the fused ReLU/conv/BN Pallas building block against XLA conv.
    st = params["stem"]
    x_nhwc = jnp.transpose(x, (0, 2, 3, 1))
    y_pal = conv_bn(x_nhwc, st["w"], st["s"], st["b"], k=3, stride=1, padding=1,
                    relu_in=False)
    w_hwio = st["w"].reshape(3, 3, 3, -1)
    y_ref = jax.lax.conv_general_dilated(
        x_nhwc, w_hwio, window_strides=(1, 1), padding="SAME",
        dimension_numbers=("NHWC", "HWIO", "NHWC"))
    y_ref = y_ref * st["s"].reshape(1, 1, 1, -1) + st["b"].reshape(1, 1, 1, -1)
    assert bool(jnp.allclose(y_pal, y_ref, atol=1e-4, rtol=1e-4))

    print("KERNEL_OK")
</pallas_src>

<mosaic_0001>
module attributes {stable_mosaic.version = 11 : i64} {
  func.func @_matmul_affine_kernel(%arg0: i32, %arg1: memref<512x27xf32, #tpu.memory_space<vmem>>, %arg2: memref<27x12xf32, #tpu.memory_space<vmem>>, %arg3: memref<1x12xf32, #tpu.memory_space<vmem>>, %arg4: memref<1x12xf32, #tpu.memory_space<vmem>>, %arg5: memref<512x12xf32, #tpu.memory_space<vmem>>) attributes {dimension_semantics = [#tpu.dimension_semantics<arbitrary>], iteration_bounds = array<i64: 1>, scalar_prefetch = 0 : i64, scratch_operands = 0 : i64, tpu.core_type = #tpu.core_type<tc>, window_params = [{pipeline_mode = #tpu.pipeline_mode<synchronous>, transform_indices = @transform_0, window_bounds = array<i64: 512, 27>}, {pipeline_mode = #tpu.pipeline_mode<synchronous>, transform_indices = @transform_1, window_bounds = array<i64: 27, 12>}, {pipeline_mode = #tpu.pipeline_mode<synchronous>, transform_indices = @transform_2, window_bounds = array<i64: 1, 12>}, {pipeline_mode = #tpu.pipeline_mode<synchronous>, transform_indices = @transform_3, window_bounds = array<i64: 1, 12>}, {pipeline_mode = #tpu.pipeline_mode<synchronous>, transform_indices = @transform_4, window_bounds = array<i64: 512, 12>}]} {
    %c0 = arith.constant 0 : index
    %c0_0 = arith.constant 0 : index
    %0 = vector.load %arg1[%c0, %c0_0] : memref<512x27xf32, #tpu.memory_space<vmem>>, vector<512x27xf32>
    %c0_1 = arith.constant 0 : index
    %c0_2 = arith.constant 0 : index
    %1 = vector.load %arg2[%c0_1, %c0_2] : memref<27x12xf32, #tpu.memory_space<vmem>>, vector<27x12xf32>
    %cst = arith.constant dense<0.000000e+00> : vector<512x12xf32>
    %2 = tpu.matmul %0, %1, %cst {dimension_numbers = #tpu.dot_dimension_numbers<[1], [0], [0], [1], [0, 0, 1, 1], [], []>} : vector<512x27xf32>, vector<27x12xf32>, vector<512x12xf32> -> vector<512x12xf32>
    %c0_3 = arith.constant 0 : index
    %c0_4 = arith.constant 0 : index
    %3 = vector.load %arg3[%c0_3, %c0_4] : memref<1x12xf32, #tpu.memory_space<vmem>>, vector<1x12xf32>
    %4 = vector.broadcast %3 : vector<1x12xf32> to vector<512x12xf32>
    %5 = arith.mulf %2, %4 : vector<512x12xf32>
    %c0_5 = arith.constant 0 : index
    %c0_6 = arith.constant 0 : index
    %6 = vector.load %arg4[%c0_5, %c0_6] : memref<1x12xf32, #tpu.memory_space<vmem>>, vector<1x12xf32>
    %7 = vector.broadcast %6 : vector<1x12xf32> to vector<512x12xf32>
    %8 = arith.addf %5, %7 : vector<512x12xf32>
    %c0_7 = arith.constant 0 : index
    %c0_8 = arith.constant 0 : index
    %9 = vector.load %arg5[%c0_7, %c0_8] : memref<512x12xf32, #tpu.memory_space<vmem>>, vector<512x12xf32>
    tpu.vector_store %arg5[%c0_7, %c0_8], %8 {strides = array<i32>} : memref<512x12xf32, #tpu.memory_space<vmem>>, vector<512x12xf32>,
    return
  }
  func.func @transform_0(%arg0: i32) -> (i32, i32) {
    %c0_i32 = arith.constant 0 : i32
    %c0_i32_0 = arith.constant 0 : i32
    %c0_i32_1 = arith.constant 0 : i32
    return %c0_i32, %c0_i32_0 : i32, i32
  }
  func.func @transform_1(%arg0: i32) -> (i32, i32) {
    %c0_i32 = arith.constant 0 : i32
    %c0_i32_0 = arith.constant 0 : i32
    %c0_i32_1 = arith.constant 0 : i32
    return %c0_i32, %c0_i32_0 : i32, i32
  }
  func.func @transform_2(%arg0: i32) -> (i32, i32) {
    %c0_i32 = arith.constant 0 : i32
    %c0_i32_0 = arith.constant 0 : i32
    %c0_i32_1 = arith.constant 0 : i32
    return %c0_i32, %c0_i32_0 : i32, i32
  }
  func.func @transform_3(%arg0: i32) -> (i32, i32) {
    %c0_i32 = arith.constant 0 : i32
    %c0_i32_0 = arith.constant 0 : i32
    %c0_i32_1 = arith.constant 0 : i32
    return %c0_i32, %c0_i32_0 : i32, i32
  }
  func.func @transform_4(%arg0: i32) -> (i32, i32) {
    %c0_i32 = arith.constant 0 : i32
    %c0_i32_0 = arith.constant 0 : i32
    %c0_i32_1 = arith.constant 0 : i32
    return %c0_i32, %c0_i32_0 : i32, i32
  }
}

</mosaic_0001>

<bundles_post_ra>
// kernel: matmul_affine.1
= control target key start
LH: loop header
LB: loop body
LE: loop exit
PB: predicated region body
PF: predicated region fallthrough
CT: control target
= control target key end

     0   :  { %vm278_vm0 = vcmask 1042432   ;;  %vm85_vm1 = vcmask 220160   ;;  %vm1132_vm2 = vmmov 1   ;;  %vm809_vm4 = vcmask 97280   ;;  %s1820_s1 = inlined_call_operand.vmem [shape: f32[27,12], index: 1, kind: input, shape index: {}]   ;;  %s1821_s0 = inlined_call_operand.vmem [shape: f32[512,27], index: 0, kind: input, shape index: {}]   ;;  %s1822_s2 = inlined_call_operand.vmem [shape: f32[1,12], index: 2, kind: input, shape index: {}]   ;;  %s1823_s3 = inlined_call_operand.vmem [shape: f32[1,12], index: 3, kind: input, shape index: {}]   ;;  %s1824_s4 = inlined_call_operand.vmem [shape: f32[512,12], index: 4, kind: output, shape index: {}]  }
   0x1   :  { %v81_v0 = vld [vmem:[%s1820_s1] sm:$0xff]  ;;  %v82_v1 = vld [vmem:[%s1820_s1 + $0x8] sm:$0xff]  ;;  %v83_v2 = vld [vmem:[%s1820_s1 + $0x10] sm:$0xff] }
   0x2   :  { %v1117_v3 = vpack.c.bf16 %v82_v1, %v81_v0  ;;  %v84_v4 = vld [vmem:[%s1820_s1 + $0x18] sm:$0x7]  ;;  %v17_v5 = vld [vmem:[%s1821_s0] sm:$0xff]  ;;  %vm1122_vm3 = vmpackc.low %vm278_vm0, %vm1132_vm2 }
   0x3   :  { %v1121_v6 = vpack.c.bf16 %v84_v4, %v83_v2  ;;  %1021 = vmatprep.mubr.msk.f32.mxu0 %vm85_vm1, %v17_v5  ;;  %v49_v7 = vld [vmem:[%s1821_s0 + $0x100] sm:$0xff]  ;;  %v18_v8 = vld [vmem:[%s1821_s0 + $0x8] sm:$0xff]  ;;  %v19_v10 = vld [vmem:[%s1821_s0 + $0x10] sm:$0xff] }
   0x4   :  { %1118 = vmatprep.subr.bf16.mxu0 %v1117_v3  ;;  %1127 = vmatprep.subr.bf16.mxu1 %v1117_v3  ;;  %v50_v9 = vld [vmem:[%s1821_s0 + $0x108] sm:$0xff]  ;;  %v51_v11 = vld [vmem:[%s1821_s0 + $0x110] sm:$0xff]  ;;  %v20_v12 = vld [vmem:[%s1821_s0 + $0x18] sm:$0xff] }
   0x5   :  { %1120 = vmatpush3.bf16.msra.mxu0 %v1117_v3  ;;  %1129 = vmatpush3.bf16.msra.mxu1 %v1117_v3  ;;  %v52_v13 = vld [vmem:[%s1821_s0 + $0x118] sm:$0xff]  ;;  %v21_v14 = vld [vmem:[%s1821_s0 + $0x20] sm:$0xff]  ;;  %v22_v16 = vld [vmem:[%s1821_s0 + $0x28] sm:$0xff] }
   0x6   :  { %1123 = vmatprep.subr.msk.bf16.mxu0 %vm1122_vm3, %v1121_v6  ;;  %1128 = vmatprep.subr.msk.bf16.mxu1 %vm1122_vm3, %v1121_v6  ;;  %v53_v15 = vld [vmem:[%s1821_s0 + $0x120] sm:$0xff]  ;;  %v54_v17 = vld [vmem:[%s1821_s0 + $0x128] sm:$0xff]  ;;  %v23_v18 = vld [vmem:[%s1821_s0 + $0x30] sm:$0xff] }
   0x7   :  { %1069 = vmatprep.mubr.msk.f32.mxu1 %vm85_vm1, %v49_v7  ;;  %v55_v19 = vld [vmem:[%s1821_s0 + $0x130] sm:$0xff]  ;;  %v24_v20 = vld [vmem:[%s1821_s0 + $0x38] sm:$0xff]  ;;  %v25_v22 = vld [vmem:[%s1821_s0 + $0x40] sm:$0xff] }
   0x8   :  { %v56_v21 = vld [vmem:[%s1821_s0 + $0x138] sm:$0xff]  ;;  %v57_v23 = vld [vmem:[%s1821_s0 + $0x140] sm:$0xff]  ;;  %v26_v24 = vld [vmem:[%s1821_s0 + $0x48] sm:$0xff] }
   0x9   :  { %1126 = vmatpush3.bf16.msk.msra.mxu0 %vm1122_vm3, %v1121_v6  ;;  %1130 = vmatpush3.bf16.msk.msra.mxu1 %vm1122_vm3, %v1121_v6  ;;  %v58_v25 = vld [vmem:[%s1821_s0 + $0x148] sm:$0xff]  ;;  %v27_v26 = vld [vmem:[%s1821_s0 + $0x50] sm:$0xff]  ;;  %v28_v28 = vld [vmem:[%s1821_s0 + $0x58] sm:$0xff] }
   0xa   :  { %v59_v27 = vld [vmem:[%s1821_s0 + $0x150] sm:$0xff]  ;;  %v60_v29 = vld [vmem:[%s1821_s0 + $0x158] sm:$0xff]  ;;  %v29_v30 = vld [vmem:[%s1821_s0 + $0x60] sm:$0xff] }
   0xb   :  { %v61_v31 = vld [vmem:[%s1821_s0 + $0x160] sm:$0xff]  ;;  %v30_v32 = vld [vmem:[%s1821_s0 + $0x68] sm:$0xff]  ;;  %v31_v34 = vld [vmem:[%s1821_s0 + $0x70] sm:$0xff] }
   0xc   :  { %1022 = vmatmul.mubr.msk.f32.vlgmr.msra.gmra.mrb[0].mxu0 %vm85_vm1, %v18_v8  ;;  %1070 = vmatmul.mubr.msk.f32.vlgmr.msra.gmra.mrb[0].mxu1 %vm85_vm1, %v50_v9  ;;  %v62_v33 = vld [vmem:[%s1821_s0 + $0x168] sm:$0xff]  ;;  %v63_v35 = vld [vmem:[%s1821_s0 + $0x170] sm:$0xff]  ;;  %v32_v36 = vld [vmem:[%s1821_s0 + $0x78] sm:$0xff] }
   0xd   :  { %1024 = vmatprep.mubr.msk.f32.mxu0 %vm85_vm1, %v19_v10  ;;  %1072 = vmatprep.mubr.msk.f32.mxu1 %vm85_vm1, %v51_v11  ;;  %v64_v37 = vld [vmem:[%s1821_s0 + $0x178] sm:$0xff]  ;;  %v33_v38 = vld [vmem:[%s1821_s0 + $0x80] sm:$0xff]  ;;  %v34_v40 = vld [vmem:[%s1821_s0 + $0x88] sm:$0xff] }
   0xe   :  { %v65_v39 = vld [vmem:[%s1821_s0 + $0x180] sm:$0xff]  ;;  %v66_v41 = vld [vmem:[%s1821_s0 + $0x188] sm:$0xff]  ;;  %v35_v42 = vld [vmem:[%s1821_s0 + $0x90] sm:$0xff] }
   0xf   :  { %v67_v43 = vld [vmem:[%s1821_s0 + $0x190] sm:$0xff]  ;;  %v36_v44 = vld [vmem:[%s1821_s0 + $0x98] sm:$0xff]  ;;  %v37_v46 = vld [vmem:[%s1821_s0 + $0xa0] sm:$0xff] }
  0x10   :  { %1025 = vmatmul.mubr.msk.f32.gmra.mrb[2].mxu0 %vm85_vm1, %v20_v12  ;;  %1073 = vmatmul.mubr.msk.f32.gmra.mrb[2].mxu1 %vm85_vm1, %v52_v13  ;;  %v68_v45 = vld [vmem:[%s1821_s0 + $0x198] sm:$0xff]  ;;  %v69_v47 = vld [vmem:[%s1821_s0 + $0x1a0] sm:$0xff]  ;;  %v38_v48 = vld [vmem:[%s1821_s0 + $0xa8] sm:$0xff] }
  0x11   :  { %1027 = vmatprep.mubr.msk.f32.mxu0 %vm85_vm1, %v21_v14  ;;  %1075 = vmatprep.mubr.msk.f32.mxu1 %vm85_vm1, %v53_v15  ;;  %v70_v49 = vld [vmem:[%s1821_s0 + $0x1a8] sm:$0xff]  ;;  %v39_v50 = vld [vmem:[%s1821_s0 + $0xb0] sm:$0xff]  ;;  %v40_v52 = vld [vmem:[%s1821_s0 + $0xb8] sm:$0xff] }
  0x12   :  { %v71_v51 = vld [vmem:[%s1821_s0 + $0x1b0] sm:$0xff]  ;;  %v72_v53 = vld [vmem:[%s1821_s0 + $0x1b8] sm:$0xff]  ;;  %v41_v54 = vld [vmem:[%s1821_s0 + $0xc0] sm:$0xff] }
  0x13   :  { %v73_v55 = vld [vmem:[%s1821_s0 + $0x1c0] sm:$0xff]  ;;  %v42_v56 = vld [vmem:[%s1821_s0 + $0xc8] sm:$0xff]  ;;  %v43_v58 = vld [vmem:[%s1821_s0 + $0xd0] sm:$0xff] }
  0x14   :  { %1028 = vmatmul.mubr.msk.f32.gmra.mrb[4].mxu0 %vm85_vm1, %v22_v16  ;;  %1076 = vmatmul.mubr.msk.f32.gmra.mrb[4].mxu1 %vm85_vm1, %v54_v17  ;;  %v74_v57 = vld [vmem:[%s1821_s0 + $0x1c8] sm:$0xff]  ;;  %v75_v59 = vld [vmem:[%s1821_s0 + $0x1d0] sm:$0xff]  ;;  %v44_v60 = vld [vmem:[%s1821_s0 + $0xd8] sm:$0xff] }
  0x15   :  { %1030 = vmatprep.mubr.msk.f32.mxu0 %vm85_vm1, %v23_v18  ;;  %1078 = vmatprep.mubr.msk.f32.mxu1 %vm85_vm1, %v55_v19  ;;  %v76_v61 = vld [vmem:[%s1821_s0 + $0x1d8] sm:$0xff]  ;;  %v45_v62 = vld [vmem:[%s1821_s0 + $0xe0] sm:$0xff]  ;;  %v46_v0 = vld [vmem:[%s1821_s0 + $0xe8] sm:$0xff] }
  0x16   :  { %v77_v63 = vld [vmem:[%s1821_s0 + $0x1e0] sm:$0xff]  ;;  %v78_v1 = vld [vmem:[%s1821_s0 + $0x1e8] sm:$0xff]  ;;  %v47_v2 = vld [vmem:[%s1821_s0 + $0xf0] sm:$0xff] }
  0x17   :  { %v79_v3 = vld [vmem:[%s1821_s0 + $0x1f0] sm:$0xff]  ;;  %v48_v4 = vld [vmem:[%s1821_s0 + $0xf8] sm:$0xff]  ;;  %v1429_v6 = vld [vmem:[%s1822_s2] ss:$0 sm:$0xff] }
  0x18   :  { %1031 = vmatmul.mubr.msk.f32.gmra.mrb[6].mxu0 %vm85_vm1, %v24_v20  ;;  %1079 = vmatmul.mubr.msk.f32.gmra.mrb[6].mxu1 %vm85_vm1, %v56_v21  ;;  %v80_v5 = vld [vmem:[%s1821_s0 + $0x1f8] sm:$0xff]  ;;  %v1434_v8 = vld [vmem:[%s1823_s3] ss:$0 sm:$0xff] }
  0x19   :  { %1033 = vmatprep.mubr.msk.f32.mxu0 %vm85_vm1, %v25_v22  ;;  %1081 = vmatprep.mubr.msk.f32.mxu1 %vm85_vm1, %v57_v23 }
  0x1c   :  { %1034 = vmatmul.mubr.msk.f32.gmra.mrb[8].mxu0 %vm85_vm1, %v26_v24  ;;  %1082 = vmatmul.mubr.msk.f32.gmra.mrb[8].mxu1 %vm85_vm1, %v58_v25 }
  0x1d   :  { %1036 = vmatprep.mubr.msk.f32.mxu0 %vm85_vm1, %v27_v26  ;;  %1084 = vmatprep.mubr.msk.f32.mxu1 %vm85_vm1, %v59_v27 }
  0x20   :  { %1037 = vmatmul.mubr.msk.f32.gmra.mrb[10].mxu0 %vm85_vm1, %v28_v28  ;;  %1085 = vmatmul.mubr.msk.f32.gmra.mrb[10].mxu1 %vm85_vm1, %v60_v29 }
  0x21   :  { %1039 = vmatprep.mubr.msk.f32.mxu0 %vm85_vm1, %v29_v30  ;;  %1087 = vmatprep.mubr.msk.f32.mxu1 %vm85_vm1, %v61_v31 }
  0x24   :  { %1040 = vmatmul.mubr.msk.f32.gmra.mrb[12].mxu0 %vm85_vm1, %v30_v32  ;;  %1088 = vmatmul.mubr.msk.f32.gmra.mrb[12].mxu1 %vm85_vm1, %v62_v33 }
  0x25   :  { %1042 = vmatprep.mubr.msk.f32.mxu0 %vm85_vm1, %v31_v34  ;;  %1090 = vmatprep.mubr.msk.f32.mxu1 %vm85_vm1, %v63_v35 }
  0x28   :  { %1043 = vmatmul.mubr.msk.f32.gmra.mrb[14].mxu0 %vm85_vm1, %v32_v36  ;;  %1091 = vmatmul.mubr.msk.f32.gmra.mrb[14].mxu1 %vm85_vm1, %v64_v37 }
  0x29   :  { %1045 = vmatprep.mubr.msk.f32.mxu0 %vm85_vm1, %v33_v38  ;;  %1093 = vmatprep.mubr.msk.f32.mxu1 %vm85_vm1, %v65_v39 }
  0x2c   :  { %1046 = vmatmul.mubr.msk.f32.gmra.mrb[16].mxu0 %vm85_vm1, %v34_v40  ;;  %1094 = vmatmul.mubr.msk.f32.gmra.mrb[16].mxu1 %vm85_vm1, %v66_v41 }
  0x2d   :  { %1048 = vmatprep.mubr.msk.f32.mxu0 %vm85_vm1, %v35_v42  ;;  %1096 = vmatprep.mubr.msk.f32.mxu1 %vm85_vm1, %v67_v43 }
  0x30   :  { %1049 = vmatmul.mubr.msk.f32.gmra.mrb[18].mxu0 %vm85_vm1, %v36_v44  ;;  %1097 = vmatmul.mubr.msk.f32.gmra.mrb[18].mxu1 %vm85_vm1, %v68_v45 }
  0x31   :  { %1051 = vmatprep.mubr.msk.f32.mxu0 %vm85_vm1, %v37_v46  ;;  %1099 = vmatprep.mubr.msk.f32.mxu1 %vm85_vm1, %v69_v47 }
  0x34   :  { %1052 = vmatmul.mubr.msk.f32.gmra.mrb[20].mxu0 %vm85_vm1, %v38_v48  ;;  %1100 = vmatmul.mubr.msk.f32.gmra.mrb[20].mxu1 %vm85_vm1, %v70_v49 }
  0x35   :  { %1054 = vmatprep.mubr.msk.f32.mxu0 %vm85_vm1, %v39_v50  ;;  %1102 = vmatprep.mubr.msk.f32.mxu1 %vm85_vm1, %v71_v51 }
  0x38   :  { %1055 = vmatmul.mubr.msk.f32.gmra.mrb[22].mxu0 %vm85_vm1, %v40_v52  ;;  %1103 = vmatmul.mubr.msk.f32.gmra.mrb[22].mxu1 %vm85_vm1, %v72_v53 }
  0x39   :  { %1057 = vmatprep.mubr.msk.f32.mxu0 %vm85_vm1, %v41_v54  ;;  %1105 = vmatprep.mubr.msk.f32.mxu1 %vm85_vm1, %v73_v55 }
  0x3c   :  { %1058 = vmatmul.mubr.msk.f32.gmra.mrb[24].mxu0 %vm85_vm1, %v42_v56  ;;  %1106 = vmatmul.mubr.msk.f32.gmra.mrb[24].mxu1 %vm85_vm1, %v74_v57 }
  0x3d   :  { %1060 = vmatprep.mubr.msk.f32.mxu0 %vm85_vm1, %v43_v58  ;;  %1108 = vmatprep.mubr.msk.f32.mxu1 %vm85_vm1, %v75_v59 }
  0x40   :  { %1061 = vmatmul.mubr.msk.f32.gmra.mrb[26].mxu0 %vm85_vm1, %v44_v60  ;;  %1109 = vmatmul.mubr.msk.f32.gmra.mrb[26].mxu1 %vm85_vm1, %v76_v61 }
  0x41   :  { %1063 = vmatprep.mubr.msk.f32.mxu0 %vm85_vm1, %v45_v62  ;;  %1111 = vmatprep.mubr.msk.f32.mxu1 %vm85_vm1, %v77_v63 }
  0x44   :  { %1064 = vmatmul.mubr.msk.f32.gmra.mrb[28].mxu0 %vm85_vm1, %v46_v0  ;;  %1112 = vmatmul.mubr.msk.f32.gmra.mrb[28].mxu1 %vm85_vm1, %v78_v1 }
  0x45   :  { %1066 = vmatprep.mubr.msk.f32.mxu0 %vm85_vm1, %v47_v2  ;;  %1114 = vmatprep.mubr.msk.f32.mxu1 %vm85_vm1, %v79_v3 }
  0x48   :  { %1067 = vmatmul.mubr.msk.f32.gmra.mrb[30].mxu0 %vm85_vm1, %v48_v4  ;;  %1115 = vmatmul.mubr.msk.f32.gmra.mrb[30].mxu1 %vm85_vm1, %v80_v5 }
  0xdf   :  { %v1023_v7 = vpop.f32.mrb[0].mxu0  ;;  %v1071_v9 = vpop.f32.mrb[0].mxu1 }
  0xe0   :  { %v675_v10 = vmul.f32 %v1023_v7, %v1429_v6  ;;  %v707_v11 = vmul.f32 %v1071_v9, %v1429_v6  ;;  %v348_v12 = vpop.f32.mrb[1].mxu0  ;;  %v508_v13 = vpop.f32.mrb[1].mxu1 }
  0xe1   :  { %v674_v14 = vmul.f32 %v1429_v6, %v348_v12  ;;  %v706_v15 = vmul.f32 %v1429_v6, %v508_v13 }
  0xe2   :  { %v746_v16 = vadd.f32 %v1434_v8, %v675_v10  ;;  %v778_v17 = vadd.f32 %v1434_v8, %v707_v11 }
  0xe3   :  { %v745_v18 = vadd.f32 %v1434_v8, %v674_v14  ;;  %v777_v19 = vadd.f32 %v1434_v8, %v706_v15  ;;  %v1026_v20 = vpop.f32.mrb[2].mxu0  ;;  %v1074_v21 = vpop.f32.mrb[2].mxu1 }
  0xe4   :  { %811 = vst.msk [vmem:[%s1824_s4 + $0x8] sm:$0xff] %vm809_vm4, %v746_v16  ;;  %843 = vst.msk [vmem:[%s1824_s4 + $0x108] sm:$0xff] %vm809_vm4, %v778_v17  ;;  %v677_v22 = vmul.f32 %v1026_v20, %v1429_v6  ;;  %v709_v23 = vmul.f32 %v1074_v21, %v1429_v6  ;;  %v358_v24 = vpop.f32.mrb[3].mxu0  ;;  %v518_v25 = vpop.f32.mrb[3].mxu1 }
  0xe5   :  { %810 = vst.msk [vmem:[%s1824_s4] sm:$0xff] %vm809_vm4, %v745_v18  ;;  %842 = vst.msk [vmem:[%s1824_s4 + $0x100] sm:$0xff] %vm809_vm4, %v777_v19  ;;  %v676_v26 = vmul.f32 %v1429_v6, %v358_v24  ;;  %v708_v27 = vmul.f32 %v1429_v6, %v518_v25 }
  0xe6   :  { %v748_v28 = vadd.f32 %v1434_v8, %v677_v22  ;;  %v780_v29 = vadd.f32 %v1434_v8, %v709_v23 }
  0xe7   :  { %v747_v30 = vadd.f32 %v1434_v8, %v676_v26  ;;  %v779_v31 = vadd.f32 %v1434_v8, %v708_v27  ;;  %v1029_v32 = vpop.f32.mrb[4].mxu0  ;;  %v1077_v33 = vpop.f32.mrb[4].mxu1 }
  0xe8   :  { %813 = vst.msk [vmem:[%s1824_s4 + $0x18] sm:$0xff] %vm809_vm4, %v748_v28  ;;  %845 = vst.msk [vmem:[%s1824_s4 + $0x118] sm:$0xff] %vm809_vm4, %v780_v29  ;;  %v679_v34 = vmul.f32 %v1029_v32, %v1429_v6  ;;  %v711_v35 = vmul.f32 %v1077_v33, %v1429_v6  ;;  %v368_v36 = vpop.f32.mrb[5].mxu0  ;;  %v528_v37 = vpop.f32.mrb[5].mxu1 }
  0xe9   :  { %812 = vst.msk [vmem:[%s1824_s4 + $0x10] sm:$0xff] %vm809_vm4, %v747_v30  ;;  %844 = vst.msk [vmem:[%s1824_s4 + $0x110] sm:$0xff] %vm809_vm4, %v779_v31  ;;  %v678_v38 = vmul.f32 %v1429_v6, %v368_v36  ;;  %v710_v39 = vmul.f32 %v1429_v6, %v528_v37 }
  0xea   :  { %v750_v40 = vadd.f32 %v1434_v8, %v679_v34  ;;  %v782_v41 = vadd.f32 %v1434_v8, %v711_v35 }
  0xeb   :  { %v749_v42 = vadd.f32 %v1434_v8, %v678_v38  ;;  %v781_v43 = vadd.f32 %v1434_v8, %v710_v39  ;;  %v1032_v44 = vpop.f32.mrb[6].mxu0  ;;  %v1080_v45 = vpop.f32.mrb[6].mxu1 }
  0xec   :  { %815 = vst.msk [vmem:[%s1824_s4 + $0x28] sm:$0xff] %vm809_vm4, %v750_v40  ;;  %847 = vst.msk [vmem:[%s1824_s4 + $0x128] sm:$0xff] %vm809_vm4, %v782_v41  ;;  %v681_v46 = vmul.f32 %v1032_v44, %v1429_v6  ;;  %v713_v47 = vmul.f32 %v1080_v45, %v1429_v6  ;;  %v378_v48 = vpop.f32.mrb[7].mxu0  ;;  %v538_v49 = vpop.f32.mrb[7].mxu1 }
  0xed   :  { %814 = vst.msk [vmem:[%s1824_s4 + $0x20] sm:$0xff] %vm809_vm4, %v749_v42  ;;  %846 = vst.msk [vmem:[%s1824_s4 + $0x120] sm:$0xff] %vm809_vm4, %v781_v43  ;;  %v680_v50 = vmul.f32 %v1429_v6, %v378_v48  ;;  %v712_v51 = vmul.f32 %v1429_v6, %v538_v49 }
  0xee   :  { %v752_v52 = vadd.f32 %v1434_v8, %v681_v46  ;;  %v784_v53 = vadd.f32 %v1434_v8, %v713_v47 }
  0xef   :  { %v751_v54 = vadd.f32 %v1434_v8, %v680_v50  ;;  %v783_v55 = vadd.f32 %v1434_v8, %v712_v51  ;;  %v1035_v56 = vpop.f32.mrb[8].mxu0  ;;  %v1083_v57 = vpop.f32.mrb[8].mxu1 }
  0xf0   :  { %817 = vst.msk [vmem:[%s1824_s4 + $0x38] sm:$0xff] %vm809_vm4, %v752_v52  ;;  %849 = vst.msk [vmem:[%s1824_s4 + $0x138] sm:$0xff] %vm809_vm4, %v784_v53  ;;  %v683_v58 = vmul.f32 %v1035_v56, %v1429_v6  ;;  %v715_v59 = vmul.f32 %v1083_v57, %v1429_v6  ;;  %v388_v60 = vpop.f32.mrb[9].mxu0  ;;  %v548_v61 = vpop.f32.mrb[9].mxu1 }
  0xf1   :  { %816 = vst.msk [vmem:[%s1824_s4 + $0x30] sm:$0xff] %vm809_vm4, %v751_v54  ;;  %848 = vst.msk [vmem:[%s1824_s4 + $0x130] sm:$0xff] %vm809_vm4, %v783_v55  ;;  %v682_v62 = vmul.f32 %v1429_v6, %v388_v60  ;;  %v714_v63 = vmul.f32 %v1429_v6, %v548_v61 }
  0xf2   :  { %v754_v0 = vadd.f32 %v1434_v8, %v683_v58  ;;  %v786_v1 = vadd.f32 %v1434_v8, %v715_v59 }
  0xf3   :  { %v753_v2 = vadd.f32 %v1434_v8, %v682_v62  ;;  %v785_v3 = vadd.f32 %v1434_v8, %v714_v63  ;;  %v1038_v4 = vpop.f32.mrb[10].mxu0  ;;  %v1086_v5 = vpop.f32.mrb[10].mxu1 }
  0xf4   :  { %819 = vst.msk [vmem:[%s1824_s4 + $0x48] sm:$0xff] %vm809_vm4, %v754_v0  ;;  %851 = vst.msk [vmem:[%s1824_s4 + $0x148] sm:$0xff] %vm809_vm4, %v786_v1  ;;  %v685_v7 = vmul.f32 %v1038_v4, %v1429_v6  ;;  %v717_v9 = vmul.f32 %v1086_v5, %v1429_v6  ;;  %v398_v10 = vpop.f32.mrb[11].mxu0  ;;  %v558_v11 = vpop.f32.mrb[11].mxu1 }
  0xf5   :  { %818 = vst.msk [vmem:[%s1824_s4 + $0x40] sm:$0xff] %vm809_vm4, %v753_v2  ;;  %850 = vst.msk [vmem:[%s1824_s4 + $0x140] sm:$0xff] %vm809_vm4, %v785_v3  ;;  %v684_v12 = vmul.f32 %v1429_v6, %v398_v10  ;;  %v716_v13 = vmul.f32 %v1429_v6, %v558_v11 }
  0xf6   :  { %v756_v14 = vadd.f32 %v1434_v8, %v685_v7  ;;  %v788_v15 = vadd.f32 %v1434_v8, %v717_v9 }
  0xf7   :  { %v755_v16 = vadd.f32 %v1434_v8, %v684_v12  ;;  %v787_v17 = vadd.f32 %v1434_v8, %v716_v13  ;;  %v1041_v18 = vpop.f32.mrb[12].mxu0  ;;  %v1089_v19 = vpop.f32.mrb[12].mxu1 }
  0xf8   :  { %821 = vst.msk [vmem:[%s1824_s4 + $0x58] sm:$0xff] %vm809_vm4, %v756_v14  ;;  %853 = vst.msk [vmem:[%s1824_s4 + $0x158] sm:$0xff] %vm809_vm4, %v788_v15  ;;  %v687_v20 = vmul.f32 %v1041_v18, %v1429_v6  ;;  %v719_v21 = vmul.f32 %v1089_v19, %v1429_v6  ;;  %v408_v22 = vpop.f32.mrb[13].mxu0  ;;  %v568_v23 = vpop.f32.mrb[13].mxu1 }
  0xf9   :  { %820 = vst.msk [vmem:[%s1824_s4 + $0x50] sm:$0xff] %vm809_vm4, %v755_v16  ;;  %852 = vst.msk [vmem:[%s1824_s4 + $0x150] sm:$0xff] %vm809_vm4, %v787_v17  ;;  %v686_v24 = vmul.f32 %v1429_v6, %v408_v22  ;;  %v718_v25 = vmul.f32 %v1429_v6, %v568_v23 }
  0xfa   :  { %v758_v26 = vadd.f32 %v1434_v8, %v687_v20  ;;  %v790_v27 = vadd.f32 %v1434_v8, %v719_v21 }
  0xfb   :  { %v757_v28 = vadd.f32 %v1434_v8, %v686_v24  ;;  %v789_v29 = vadd.f32 %v1434_v8, %v718_v25  ;;  %v1044_v30 = vpop.f32.mrb[14].mxu0  ;;  %v1092_v31 = vpop.f32.mrb[14].mxu1 }
  0xfc   :  { %823 = vst.msk [vmem:[%s1824_s4 + $0x68] sm:$0xff] %vm809_vm4, %v758_v26  ;;  %855 = vst.msk [vmem:[%s1824_s4 + $0x168] sm:$0xff] %vm809_vm4, %v790_v27  ;;  %v689_v32 = vmul.f32 %v1044_v30, %v1429_v6  ;;  %v721_v33 = vmul.f32 %v1092_v31, %v1429_v6  ;;  %v418_v34 = vpop.f32.mrb[15].mxu0  ;;  %v578_v35 = vpop.f32.mrb[15].mxu1 }
  0xfd   :  { %822 = vst.msk [vmem:[%s1824_s4 + $0x60] sm:$0xff] %vm809_vm4, %v757_v28  ;;  %854 = vst.msk [vmem:[%s1824_s4 + $0x160] sm:$0xff] %vm809_vm4, %v789_v29  ;;  %v688_v36 = vmul.f32 %v1429_v6, %v418_v34  ;;  %v720_v37 = vmul.f32 %v1429_v6, %v578_v35 }
  0xfe   :  { %v760_v38 = vadd.f32 %v1434_v8, %v689_v32  ;;  %v792_v39 = vadd.f32 %v1434_v8, %v721_v33 }
  0xff   :  { %v759_v40 = vadd.f32 %v1434_v8, %v688_v36  ;;  %v791_v41 = vadd.f32 %v1434_v8, %v720_v37  ;;  %v1047_v42 = vpop.f32.mrb[16].mxu0  ;;  %v1095_v43 = vpop.f32.mrb[16].mxu1 }
 0x100   :  { %825 = vst.msk [vmem:[%s1824_s4 + $0x78] sm:$0xff] %vm809_vm4, %v760_v38  ;;  %857 = vst.msk [vmem:[%s1824_s4 + $0x178] sm:$0xff] %vm809_vm4, %v792_v39  ;;  %v691_v44 = vmul.f32 %v1047_v42, %v1429_v6  ;;  %v723_v45 = vmul.f32 %v1095_v43, %v1429_v6  ;;  %v428_v46 = vpop.f32.mrb[17].mxu0  ;;  %v588_v47 = vpop.f32.mrb[17].mxu1 }
 0x101   :  { %824 = vst.msk [vmem:[%s1824_s4 + $0x70] sm:$0xff] %vm809_vm4, %v759_v40  ;;  %856 = vst.msk [vmem:[%s1824_s4 + $0x170] sm:$0xff] %vm809_vm4, %v791_v41  ;;  %v690_v48 = vmul.f32 %v1429_v6, %v428_v46  ;;  %v722_v49 = vmul.f32 %v1429_v6, %v588_v47 }
 0x102   :  { %v762_v50 = vadd.f32 %v1434_v8, %v691_v44  ;;  %v794_v51 = vadd.f32 %v1434_v8, %v723_v45 }
 0x103   :  { %v761_v52 = vadd.f32 %v1434_v8, %v690_v48  ;;  %v793_v53 = vadd.f32 %v1434_v8, %v722_v49  ;;  %v1050_v54 = vpop.f32.mrb[18].mxu0  ;;  %v1098_v55 = vpop.f32.mrb[18].mxu1 }
 0x104   :  { %827 = vst.msk [vmem:[%s1824_s4 + $0x88] sm:$0xff] %vm809_vm4, %v762_v50  ;;  %859 = vst.msk [vmem:[%s1824_s4 + $0x188] sm:$0xff] %vm809_vm4, %v794_v51  ;;  %v693_v56 = vmul.f32 %v1050_v54, %v1429_v6  ;;  %v725_v57 = vmul.f32 %v1098_v55, %v1429_v6  ;;  %v438_v58 = vpop.f32.mrb[19].mxu0  ;;  %v598_v59 = vpop.f32.mrb[19].mxu1 }
 0x105   :  { %826 = vst.msk [vmem:[%s1824_s4 + $0x80] sm:$0xff] %vm809_vm4, %v761_v52  ;;  %858 = vst.msk [vmem:[%s1824_s4 + $0x180] sm:$0xff] %vm809_vm4, %v793_v53  ;;  %v692_v60 = vmul.f32 %v1429_v6, %v438_v58  ;;  %v724_v61 = vmul.f32 %v1429_v6, %v598_v59 }
 0x106   :  { %v764_v62 = vadd.f32 %v1434_v8, %v693_v56  ;;  %v796_v63 = vadd.f32 %v1434_v8, %v725_v57 }
 0x107   :  { %v763_v0 = vadd.f32 %v1434_v8, %v692_v60  ;;  %v795_v1 = vadd.f32 %v1434_v8, %v724_v61  ;;  %v1053_v2 = vpop.f32.mrb[20].mxu0  ;;  %v1101_v3 = vpop.f32.mrb[20].mxu1 }
 0x108   :  { %829 = vst.msk [vmem:[%s1824_s4 + $0x98] sm:$0xff] %vm809_vm4, %v764_v62  ;;  %861 = vst.msk [vmem:[%s1824_s4 + $0x198] sm:$0xff] %vm809_vm4, %v796_v63  ;;  %v695_v4 = vmul.f32 %v1053_v2, %v1429_v6  ;;  %v727_v5 = vmul.f32 %v1101_v3, %v1429_v6  ;;  %v448_v7 = vpop.f32.mrb[21].mxu0  ;;  %v608_v9 = vpop.f32.mrb[21].mxu1 }
 0x109   :  { %828 = vst.msk [vmem:[%s1824_s4 + $0x90] sm:$0xff] %vm809_vm4, %v763_v0  ;;  %860 = vst.msk [vmem:[%s1824_s4 + $0x190] sm:$0xff] %vm809_vm4, %v795_v1  ;;  %v694_v10 = vmul.f32 %v1429_v6, %v448_v7  ;;  %v726_v11 = vmul.f32 %v1429_v6, %v608_v9 }
 0x10a   :  { %v766_v12 = vadd.f32 %v1434_v8, %v695_v4  ;;  %v798_v13 = vadd.f32 %v1434_v8, %v727_v5 }
 0x10b   :  { %v765_v14 = vadd.f32 %v1434_v8, %v694_v10  ;;  %v797_v15 = vadd.f32 %v1434_v8, %v726_v11  ;;  %v1056_v16 = vpop.f32.mrb[22].mxu0  ;;  %v1104_v17 = vpop.f32.mrb[22].mxu1 }
 0x10c   :  { %831 = vst.msk [vmem:[%s1824_s4 + $0xa8] sm:$0xff] %vm809_vm4, %v766_v12  ;;  %863 = vst.msk [vmem:[%s1824_s4 + $0x1a8] sm:$0xff] %vm809_vm4, %v798_v13  ;;  %v697_v18 = vmul.f32 %v1056_v16, %v1429_v6  ;;  %v729_v19 = vmul.f32 %v1104_v17, %v1429_v6  ;;  %v458_v20 = vpop.f32.mrb[23].mxu0  ;;  %v618_v21 = vpop.f32.mrb[23].mxu1 }
 0x10d   :  { %830 = vst.msk [vmem:[%s1824_s4 + $0xa0] sm:$0xff] %vm809_vm4, %v765_v14  ;;  %862 = vst.msk [vmem:[%s1824_s4 + $0x1a0] sm:$0xff] %vm809_vm4, %v797_v15  ;;  %v696_v22 = vmul.f32 %v1429_v6, %v458_v20  ;;  %v728_v23 = vmul.f32 %v1429_v6, %v618_v21 }
 0x10e   :  { %v768_v24 = vadd.f32 %v1434_v8, %v697_v18  ;;  %v800_v25 = vadd.f32 %v1434_v8, %v729_v19 }
 0x10f   :  { %v767_v26 = vadd.f32 %v1434_v8, %v696_v22  ;;  %v799_v27 = vadd.f32 %v1434_v8, %v728_v23  ;;  %v1059_v28 = vpop.f32.mrb[24].mxu0  ;;  %v1107_v29 = vpop.f32.mrb[24].mxu1 }
 0x110   :  { %833 = vst.msk [vmem:[%s1824_s4 + $0xb8] sm:$0xff] %vm809_vm4, %v768_v24  ;;  %865 = vst.msk [vmem:[%s1824_s4 + $0x1b8] sm:$0xff] %vm809_vm4, %v800_v25  ;;  %v699_v30 = vmul.f32 %v1059_v28, %v1429_v6  ;;  %v731_v31 = vmul.f32 %v1107_v29, %v1429_v6  ;;  %v468_v32 = vpop.f32.mrb[25].mxu0  ;;  %v628_v33 = vpop.f32.mrb[25].mxu1 }
 0x111   :  { %832 = vst.msk [vmem:[%s1824_s4 + $0xb0] sm:$0xff] %vm809_vm4, %v767_v26  ;;  %864 = vst.msk [vmem:[%s1824_s4 + $0x1b0] sm:$0xff] %vm809_vm4, %v799_v27  ;;  %v698_v34 = vmul.f32 %v1429_v6, %v468_v32  ;;  %v730_v35 = vmul.f32 %v1429_v6, %v628_v33 }
 0x112   :  { %v770_v36 = vadd.f32 %v1434_v8, %v699_v30  ;;  %v802_v37 = vadd.f32 %v1434_v8, %v731_v31 }
 0x113   :  { %v769_v38 = vadd.f32 %v1434_v8, %v698_v34  ;;  %v801_v39 = vadd.f32 %v1434_v8, %v730_v35  ;;  %v1062_v40 = vpop.f32.mrb[26].mxu0  ;;  %v1110_v41 = vpop.f32.mrb[26].mxu1 }
 0x114   :  { %835 = vst.msk [vmem:[%s1824_s4 + $0xc8] sm:$0xff] %vm809_vm4, %v770_v36  ;;  %867 = vst.msk [vmem:[%s1824_s4 + $0x1c8] sm:$0xff] %vm809_vm4, %v802_v37  ;;  %v701_v42 = vmul.f32 %v1062_v40, %v1429_v6  ;;  %v733_v43 = vmul.f32 %v1110_v41, %v1429_v6  ;;  %v478_v44 = vpop.f32.mrb[27].mxu0  ;;  %v638_v45 = vpop.f32.mrb[27].mxu1 }
 0x115   :  { %834 = vst.msk [vmem:[%s1824_s4 + $0xc0] sm:$0xff] %vm809_vm4, %v769_v38  ;;  %866 = vst.msk [vmem:[%s1824_s4 + $0x1c0] sm:$0xff] %vm809_vm4, %v801_v39  ;;  %v700_v46 = vmul.f32 %v1429_v6, %v478_v44  ;;  %v732_v47 = vmul.f32 %v1429_v6, %v638_v45 }
 0x116   :  { %v772_v48 = vadd.f32 %v1434_v8, %v701_v42  ;;  %v804_v49 = vadd.f32 %v1434_v8, %v733_v43 }
 0x117   :  { %v771_v50 = vadd.f32 %v1434_v8, %v700_v46  ;;  %v803_v51 = vadd.f32 %v1434_v8, %v732_v47  ;;  %v1065_v52 = vpop.f32.mrb[28].mxu0  ;;  %v1113_v53 = vpop.f32.mrb[28].mxu1 }
 0x118   :  { %837 = vst.msk [vmem:[%s1824_s4 + $0xd8] sm:$0xff] %vm809_vm4, %v772_v48  ;;  %869 = vst.msk [vmem:[%s1824_s4 + $0x1d8] sm:$0xff] %vm809_vm4, %v804_v49  ;;  %v703_v54 = vmul.f32 %v1065_v52, %v1429_v6  ;;  %v735_v55 = vmul.f32 %v1113_v53, %v1429_v6  ;;  %v488_v56 = vpop.f32.mrb[29].mxu0  ;;  %v648_v57 = vpop.f32.mrb[29].mxu1 }
 0x119   :  { %836 = vst.msk [vmem:[%s1824_s4 + $0xd0] sm:$0xff] %vm809_vm4, %v771_v50  ;;  %868 = vst.msk [vmem:[%s1824_s4 + $0x1d0] sm:$0xff] %vm809_vm4, %v803_v51  ;;  %v702_v58 = vmul.f32 %v1429_v6, %v488_v56  ;;  %v734_v59 = vmul.f32 %v1429_v6, %v648_v57 }
 0x11a   :  { %v774_v60 = vadd.f32 %v1434_v8, %v703_v54  ;;  %v806_v61 = vadd.f32 %v1434_v8, %v735_v55 }
 0x11b   :  { %v773_v62 = vadd.f32 %v1434_v8, %v702_v58  ;;  %v805_v63 = vadd.f32 %v1434_v8, %v734_v59  ;;  %v1068_v0 = vpop.f32.mrb[30].mxu0  ;;  %v1116_v1 = vpop.f32.mrb[30].mxu1 }
 0x11c   :  { %839 = vst.msk [vmem:[%s1824_s4 + $0xe8] sm:$0xff] %vm809_vm4, %v774_v60  ;;  %871 = vst.msk [vmem:[%s1824_s4 + $0x1e8] sm:$0xff] %vm809_vm4, %v806_v61  ;;  %v705_v2 = vmul.f32 %v1068_v0, %v1429_v6  ;;  %v737_v3 = vmul.f32 %v1116_v1, %v1429_v6  ;;  %v498_v4 = vpop.f32.mrb[31].mxu0  ;;  %v658_v5 = vpop.f32.mrb[31].mxu1 }
 0x11d   :  { %838 = vst.msk [vmem:[%s1824_s4 + $0xe0] sm:$0xff] %vm809_vm4, %v773_v62  ;;  %870 = vst.msk [vmem:[%s1824_s4 + $0x1e0] sm:$0xff] %vm809_vm4, %v805_v63  ;;  %v704_v7 = vmul.f32 %v1429_v6, %v498_v4  ;;  %v736_v9 = vmul.f32 %v1429_v6, %v658_v5 }
 0x11e   :  { %v776_v10 = vadd.f32 %v1434_v8, %v705_v2  ;;  %v808_v11 = vadd.f32 %v1434_v8, %v737_v3 }
 0x11f   :  { %v775_v12 = vadd.f32 %v1434_v8, %v704_v7  ;;  %v807_v13 = vadd.f32 %v1434_v8, %v736_v9 }
 0x120   :  { %841 = vst.msk [vmem:[%s1824_s4 + $0xf8] sm:$0xff] %vm809_vm4, %v776_v10  ;;  %873 = vst.msk [vmem:[%s1824_s4 + $0x1f8] sm:$0xff] %vm809_vm4, %v808_v11 }
 0x121   :  { %840 = vst.msk [vmem:[%s1824_s4 + $0xf0] sm:$0xff] %vm809_vm4, %v775_v12  ;;  %872 = vst.msk [vmem:[%s1824_s4 + $0x1f0] sm:$0xff] %vm809_vm4, %v807_v13 }

</bundles_post_ra>
